<compile_context>
chip_gen: v7x
topology: tpu7x:2x2x1
jax: 0.10.0
libtpu: 0.0.40
codegen_flags: <defaults>
</compile_context>

<pallas_src>
import functools
import math

import jax
import jax.numpy as jnp
from jax import lax
from jax.experimental import pallas as pl
from jax.experimental.pallas import tpu as pltpu

LN_EPS = 1e-12
# Explicit scoped-VMEM budget: fits v5e/v6e (128 MiB) and v7x (64 MiB) comfortably.
VMEM_LIMIT = 32 * 1024 * 1024


# ----------------------------------------------------------------------------
# Kernel 1: tiled matmul + bias epilogue  (used for the fused QKV projection)
# ----------------------------------------------------------------------------
def _matmul_bias_kernel(x_ref, w_ref, b_ref, o_ref, acc_ref):
    k = pl.program_id(2)

    @pl.when(k == 0)
    def _():
        acc_ref[...] = jnp.zeros_like(acc_ref)

    acc_ref[...] += jnp.dot(x_ref[...], w_ref[...],
                            preferred_element_type=jnp.float32)

    @pl.when(k == pl.num_programs(2) - 1)
    def _():
        o_ref[...] = (acc_ref[...] + b_ref[...]).astype(o_ref.dtype)


def linear_tiled(x, w, b, *, out_dtype=jnp.bfloat16, tm=256, tn=256, tk=512):
    """y = x @ w + b with a tiled, software-pipelined grid.

    bf16 operands, f32 accumulation in VMEM scratch. Tile sizes clamp to the
    array dims so tiny problems become a single full-block grid step; at real
    bert-base shapes they stay 256-multiples for the MXU and fit v7x VMEM with
    double buffering.
    """
    M, K = x.shape
    K2, N = w.shape
    assert K == K2
    tm, tn, tk = min(tm, M), min(tn, N), min(tk, K)
    assert M % tm == 0 and N % tn == 0 and K % tk == 0
    grid = (M // tm, N // tn, K // tk)
    return pl.pallas_call(
        _matmul_bias_kernel,
        out_shape=jax.ShapeDtypeStruct((M, N), out_dtype),
        grid_spec=pltpu.PrefetchScalarGridSpec(
            num_scalar_prefetch=0,
            grid=grid,
            in_specs=[
                pl.BlockSpec((tm, tk), lambda i, j, k: (i, k)),
                pl.BlockSpec((tk, tn), lambda i, j, k: (k, j)),
                pl.BlockSpec((1, tn), lambda i, j, k: (0, j)),
            ],
            out_specs=pl.BlockSpec((tm, tn), lambda i, j, k: (i, j)),
            scratch_shapes=[pltpu.VMEM((tm, tn), jnp.float32)],
        ),
        compiler_params=pltpu.CompilerParams(
            dimension_semantics=("parallel", "parallel", "arbitrary"),
            vmem_limit_bytes=VMEM_LIMIT),
    )(x, w, b)


# ----------------------------------------------------------------------------
# Kernel 2: LayerNorm (embeddings only; residual LNs are fused into epilogues)
# ----------------------------------------------------------------------------
def _ln_kernel(x_ref, g_ref, b_ref, o_ref, *, eps):
    x = x_ref[...].astype(jnp.float32)
    mu = jnp.mean(x, axis=-1, keepdims=True)
    var = jnp.mean((x - mu) ** 2, axis=-1, keepdims=True)
    y = (x - mu) * lax.rsqrt(var + eps)
    o_ref[...] = (y * g_ref[...] + b_ref[...]).astype(o_ref.dtype)


def layernorm(x, gamma, beta, *, out_dtype=jnp.bfloat16, tm=256, eps=LN_EPS):
    M, H = x.shape
    tm = min(tm, M)
    assert M % tm == 0
    return pl.pallas_call(
        functools.partial(_ln_kernel, eps=eps),
        out_shape=jax.ShapeDtypeStruct((M, H), out_dtype),
        grid=(M // tm,),
        in_specs=[pl.BlockSpec((tm, H), lambda i: (i, 0)),
                  pl.BlockSpec((1, H), lambda i: (0, 0)),
                  pl.BlockSpec((1, H), lambda i: (0, 0))],
        out_specs=pl.BlockSpec((tm, H), lambda i: (i, 0)),
        compiler_params=pltpu.CompilerParams(
            dimension_semantics=("parallel",),
            vmem_limit_bytes=VMEM_LIMIT),
    )(x, gamma, beta)


# ----------------------------------------------------------------------------
# Kernel 3: fused attention block = multi-head attention (from fused QKV)
#           + output projection Wo + residual add + LayerNorm
# ----------------------------------------------------------------------------
def _attn_block_kernel(qkv_ref, res_ref, mask_ref, wo_ref, bo_ref,
                       g_ref, beta_ref, o_ref, *,
                       num_heads, head_dim, scale, eps):
    hidden = num_heads * head_dim
    qkv = qkv_ref[...]          # (S, 3H) bf16
    mask = mask_ref[...]        # (1, S) f32 additive mask (0 / -10000)

    ctx_heads = []
    for hd in range(num_heads):                      # static unroll (small nH)
        q = qkv[:, hd * head_dim:(hd + 1) * head_dim]
        k = qkv[:, hidden + hd * head_dim: hidden + (hd + 1) * head_dim]
        v = qkv[:, 2 * hidden + hd * head_dim: 2 * hidden + (hd + 1) * head_dim]
        # q @ k^T via dot_general contracting on head_dim (no XLU transpose of k).
        s = lax.dot_general(q, k, (((1,), (1,)), ((), ())),
                            preferred_element_type=jnp.float32)
        s = s * scale + mask
        s = s - jnp.max(s, axis=-1, keepdims=True)
        p = jnp.exp(s)
        inv = pl.reciprocal(jnp.sum(p, axis=-1, keepdims=True), approx=True)
        p = (p * inv).astype(jnp.bfloat16)
        ctx_heads.append(jnp.dot(p, v, preferred_element_type=jnp.float32))
    ctx = jnp.concatenate(ctx_heads, axis=-1).astype(jnp.bfloat16)   # (S, H)

    attn = jnp.dot(ctx, wo_ref[...],
                   preferred_element_type=jnp.float32) + bo_ref[...]
    x = attn + res_ref[...].astype(jnp.float32)
    mu = jnp.mean(x, axis=-1, keepdims=True)
    var = jnp.mean((x - mu) ** 2, axis=-1, keepdims=True)
    y = (x - mu) * lax.rsqrt(var + eps)
    o_ref[...] = (y * g_ref[...] + beta_ref[...]).astype(o_ref.dtype)


def attention_block(qkv, h_res, ext_mask, wo, bo, ln_g, ln_b, *,
                    batch, seq, num_heads, head_dim, eps=LN_EPS):
    hidden = num_heads * head_dim
    scale = 1.0 / math.sqrt(head_dim)
    return pl.pallas_call(
        functools.partial(_attn_block_kernel, num_heads=num_heads,
                          head_dim=head_dim, scale=scale, eps=eps),
        out_shape=jax.ShapeDtypeStruct((batch * seq, hidden), jnp.bfloat16),
        grid=(batch,),
        in_specs=[
            pl.BlockSpec((seq, 3 * hidden), lambda b: (b, 0)),   # fused QKV rows
            pl.BlockSpec((seq, hidden), lambda b: (b, 0)),       # residual rows
            pl.BlockSpec((None, 1, seq), lambda b: (b, 0, 0)),   # (1, S) mask
            pl.BlockSpec((hidden, hidden), lambda b: (0, 0)),    # Wo
            pl.BlockSpec((1, hidden), lambda b: (0, 0)),         # bo
            pl.BlockSpec((1, hidden), lambda b: (0, 0)),         # ln gamma
            pl.BlockSpec((1, hidden), lambda b: (0, 0)),         # ln beta
        ],
        out_specs=pl.BlockSpec((seq, hidden), lambda b: (b, 0)),
        compiler_params=pltpu.CompilerParams(
            dimension_semantics=("parallel",),
            vmem_limit_bytes=VMEM_LIMIT),
    )(qkv, h_res, ext_mask, wo, bo, ln_g, ln_b)


# ----------------------------------------------------------------------------
# Kernel 4: fused MLP block = Wi @ GELU @ Wf + residual add + LayerNorm
# ----------------------------------------------------------------------------
def _mlp_block_kernel(h_ref, wi_ref, bi_ref, wf_ref, bf_ref, g_ref, beta_ref,
                      o_ref, *, eps):
    h_b = h_ref[...]                                             # (tm, H) bf16
    inter = jnp.dot(h_b, wi_ref[...],
                    preferred_element_type=jnp.float32) + bi_ref[...]
    # NOTE: tanh-approximate GELU in f32 (HF BERT uses erf-GELU; diff < 1e-3)
    c = jnp.float32(math.sqrt(2.0 / math.pi))
    inter = 0.5 * inter * (1.0 + jnp.tanh(c * (inter + 0.044715 * inter * inter * inter)))
    ffn = jnp.dot(inter.astype(jnp.bfloat16), wf_ref[...],
                  preferred_element_type=jnp.float32) + bf_ref[...]
    x = ffn + h_b.astype(jnp.float32)
    mu = jnp.mean(x, axis=-1, keepdims=True)
    var = jnp.mean((x - mu) ** 2, axis=-1, keepdims=True)
    y = (x - mu) * lax.rsqrt(var + eps)
    o_ref[...] = (y * g_ref[...] + beta_ref[...]).astype(o_ref.dtype)


def mlp_block(h, wi, bi, wf, bf, ln_g, ln_b, *, tm=256, eps=LN_EPS):
    M, H = h.shape
    I = wi.shape[1]
    tm = min(tm, M)
    assert M % tm == 0
    return pl.pallas_call(
        functools.partial(_mlp_block_kernel, eps=eps),
        out_shape=jax.ShapeDtypeStruct((M, H), jnp.bfloat16),
        grid=(M // tm,),
        in_specs=[
            pl.BlockSpec((tm, H), lambda i: (i, 0)),
            pl.BlockSpec((H, I), lambda i: (0, 0)),
            pl.BlockSpec((1, I), lambda i: (0, 0)),
            pl.BlockSpec((I, H), lambda i: (0, 0)),
            pl.BlockSpec((1, H), lambda i: (0, 0)),
            pl.BlockSpec((1, H), lambda i: (0, 0)),
            pl.BlockSpec((1, H), lambda i: (0, 0)),
        ],
        out_specs=pl.BlockSpec((tm, H), lambda i: (i, 0)),
        compiler_params=pltpu.CompilerParams(
            dimension_semantics=("parallel",),
            vmem_limit_bytes=VMEM_LIMIT),
    )(h, wi, bi, wf, bf, ln_g, ln_b)


# ----------------------------------------------------------------------------
# Kernel 5: fused pooler (tanh dense on CLS) + classifier, lane-dense output
# ----------------------------------------------------------------------------
def _head_kernel(cls_ref, pw_ref, pb_ref, cw_ref, cb_ref, o_ref):
    pooled = jnp.tanh(jnp.dot(cls_ref[...], pw_ref[...],
                              preferred_element_type=jnp.float32) + pb_ref[...])
    logits = jnp.dot(pooled.astype(jnp.bfloat16), cw_ref[...],
                     preferred_element_type=jnp.float32) + cb_ref[...]
    o_ref[...] = logits.astype(o_ref.dtype)


def pooler_classifier(cls_tok, pool_w, pool_b, cls_w_pad, cls_b_pad):
    B, H = cls_tok.shape
    Np = cls_w_pad.shape[1]
    return pl.pallas_call(
        _head_kernel,
        out_shape=jax.ShapeDtypeStruct((B, Np), jnp.float32),
        in_specs=[pl.BlockSpec((B, H), lambda: (0, 0)),
                  pl.BlockSpec((H, H), lambda: (0, 0)),
                  pl.BlockSpec((1, H), lambda: (0, 0)),
                  pl.BlockSpec((H, Np), lambda: (0, 0)),
                  pl.BlockSpec((1, Np), lambda: (0, 0))],
        out_specs=pl.BlockSpec((B, Np), lambda: (0, 0)),
        compiler_params=pltpu.CompilerParams(vmem_limit_bytes=VMEM_LIMIT),
    )(cls_tok, pool_w, pool_b, cls_w_pad, cls_b_pad)


# --------------------------- parameters ---------------------------

def init_params(key, cfg):
    H, I = cfg["hidden"], cfg["intermediate"]
    keys = iter(jax.random.split(key, 64))

    def w(shape):
        # weights stored bf16 (MXU operands); f32 accumulation in kernels
        return (jax.random.normal(next(keys), shape, jnp.float32) * 0.02
                ).astype(jnp.bfloat16)

    def b(n):
        return jnp.zeros((1, n), jnp.float32)

    params = {
        "word_emb": w((cfg["vocab"], H)),
        "pos_emb": w((cfg["max_pos"], H)),
        "type_emb": w((cfg["type_vocab"], H)),
        "emb_ln_g": jnp.ones((1, H), jnp.float32),
        "emb_ln_b": jnp.zeros((1, H), jnp.float32),
        "pool_w": w((H, H)), "pool_b": b(H),
        "cls_w": w((H, cfg["num_labels"])), "cls_b": b(cfg["num_labels"]),
        "layers": [],
    }
    for _ in range(cfg["layers"]):
        params["layers"].append({
            # fused QKV projection: [Wq | Wk | Wv] along the output axis
            "w_qkv": w((H, 3 * H)), "b_qkv": b(3 * H),
            "wo": w((H, H)), "bo": b(H),
            "ln1_g": jnp.ones((1, H), jnp.float32),
            "ln1_b": jnp.zeros((1, H), jnp.float32),
            "wi": w((H, I)), "bi": b(I),
            "wf": w((I, H)), "bf": b(H),
            "ln2_g": jnp.ones((1, H), jnp.float32),
            "ln2_b": jnp.zeros((1, H), jnp.float32),
        })
    return params


# --------------------------- forward pass ---------------------------

def bert_classifier_forward(params, input_ids, attention_mask, cfg):
    B, S = input_ids.shape
    H, nH = cfg["hidden"], cfg["heads"]
    dh = H // nH
    M = B * S

    # Embedding gathers stay as XLA glue (word/pos/type lookup); add + LN is a kernel.
    word = jnp.take(params["word_emb"], input_ids, axis=0).astype(jnp.float32)
    tok = jnp.take(params["type_emb"],
                   jnp.zeros((B, S), jnp.int32), axis=0).astype(jnp.float32)
    pos = jnp.broadcast_to(params["pos_emb"][:S][None].astype(jnp.float32),
                           (B, S, H))
    emb = (word + tok + pos).reshape(M, H)
    h = layernorm(emb, params["emb_ln_g"], params["emb_ln_b"])       # (M, H) bf16

    # HF extended attention mask: (1 - mask) * -10000, shape (B, 1, S)
    ext_mask = (1.0 - attention_mask.astype(jnp.float32))[:, None, :] * -10000.0

    for lp in params["layers"]:
        # 1 call: fused QKV projection -> (M, 3H)
        qkv = linear_tiled(h, lp["w_qkv"], lp["b_qkv"])
        # 1 call: attention + Wo + residual + LayerNorm (per-batch grid)
        h = attention_block(qkv, h, ext_mask, lp["wo"], lp["bo"],
                            lp["ln1_g"], lp["ln1_b"],
                            batch=B, seq=S, num_heads=nH, head_dim=dh)
        # 1 call: FFN (GELU) + residual + LayerNorm (per-M-tile grid)
        h = mlp_block(h, lp["wi"], lp["bi"], lp["wf"], lp["bf"],
                      lp["ln2_g"], lp["ln2_b"])

    # Pooler + classifier fused; classifier weights padded to a lane-dense
    # (H, 128) slab, true logits sliced out afterwards. Dropout = identity (eval).
    n_labels = cfg["num_labels"]
    n_pad = max(128, ((n_labels + 127) // 128) * 128)
    cls_w_pad = jnp.zeros((H, n_pad), jnp.bfloat16).at[:, :n_labels].set(
        params["cls_w"])
    cls_b_pad = jnp.zeros((1, n_pad), jnp.float32).at[:, :n_labels].set(
        params["cls_b"])
    cls_tok = h.reshape(B, S, H)[:, 0, :]                            # (B, H)
    logits_pad = pooler_classifier(cls_tok, params["pool_w"], params["pool_b"],
                                   cls_w_pad, cls_b_pad)
    return logits_pad[:, :n_labels]


# --------------------------- main ---------------------------

if __name__ == "__main__":
    cfg = dict(vocab=128, max_pos=16, type_vocab=2, hidden=32, heads=2,
               layers=2, intermediate=64, num_labels=2)

    key = jax.random.PRNGKey(0)
    pkey, ikey = jax.random.split(key)
    params = init_params(pkey, cfg)

    B, S = 2, 8
    input_ids = jax.random.randint(ikey, (B, S), 0, cfg["vocab"], dtype=jnp.int32)
    attention_mask = jnp.array([[1, 1, 1, 1, 1, 1, 1, 1],
                                [1, 1, 1, 1, 1, 1, 0, 0]], dtype=jnp.int32)

    logits = bert_classifier_forward(params, input_ids, attention_mask, cfg)
    jax.block_until_ready(logits)
    assert logits.shape == (B, cfg["num_labels"])
    assert bool(jnp.all(jnp.isfinite(logits)))
    print("KERNEL_OK")
</pallas_src>

<mosaic_0001>
module attributes {stable_mosaic.version = 11 : i64} {
  func.func @_ln_kernel(%arg0: i32, %arg1: memref<16x32xf32, #tpu.memory_space<vmem>>, %arg2: memref<1x32xf32, #tpu.memory_space<vmem>>, %arg3: memref<1x32xf32, #tpu.memory_space<vmem>>, %arg4: memref<16x32xbf16, #tpu.memory_space<vmem>>) attributes {dimension_semantics = [#tpu.dimension_semantics<parallel>], iteration_bounds = array<i64: 1>, scalar_prefetch = 0 : i64, scratch_operands = 0 : i64, tpu.core_type = #tpu.core_type<tc>, window_params = [{transform_indices = @transform_0, window_bounds = array<i64: 16, 32>}, {pipeline_mode = #tpu.pipeline_mode<synchronous>, transform_indices = @transform_1, window_bounds = array<i64: 1, 32>}, {pipeline_mode = #tpu.pipeline_mode<synchronous>, transform_indices = @transform_2, window_bounds = array<i64: 1, 32>}, {transform_indices = @transform_3, window_bounds = array<i64: 16, 32>}]} {
    %c0 = arith.constant 0 : index
    %c0_0 = arith.constant 0 : index
    %0 = vector.load %arg1[%c0, %c0_0] : memref<16x32xf32, #tpu.memory_space<vmem>>, vector<16x32xf32>
    %cst = arith.constant dense<0.000000e+00> : vector<16xf32>
    %1 = vector.multi_reduction <add>, %0, %cst [1] : vector<16x32xf32> to vector<16xf32>
    %2 = vector.shape_cast %1 : vector<16xf32> to vector<16x1xf32>
    %cst_1 = arith.constant 3.200000e+01 : f32
    %3 = vector.broadcast %cst_1 : f32 to vector<16x1xf32>
    %4 = arith.divf %2, %3 : vector<16x1xf32>
    %5 = vector.broadcast %4 : vector<16x1xf32> to vector<16x32xf32>
    %6 = arith.subf %0, %5 : vector<16x32xf32>
    %7 = arith.mulf %6, %6 : vector<16x32xf32>
    %cst_2 = arith.constant dense<0.000000e+00> : vector<16xf32>
    %8 = vector.multi_reduction <add>, %7, %cst_2 [1] : vector<16x32xf32> to vector<16xf32>
    %9 = vector.shape_cast %8 : vector<16xf32> to vector<16x1xf32>
    %cst_3 = arith.constant 3.200000e+01 : f32
    %10 = vector.broadcast %cst_3 : f32 to vector<16x1xf32>
    %11 = arith.divf %9, %10 : vector<16x1xf32>
    %12 = vector.broadcast %4 : vector<16x1xf32> to vector<16x32xf32>
    %13 = arith.subf %0, %12 : vector<16x32xf32>
    %cst_4 = arith.constant 9.99999996E-13 : f32
    %14 = vector.broadcast %cst_4 : f32 to vector<16x1xf32>
    %15 = arith.addf %11, %14 : vector<16x1xf32>
    %16 = math.rsqrt %15 : vector<16x1xf32>
    %17 = vector.broadcast %16 : vector<16x1xf32> to vector<16x32xf32>
    %18 = arith.mulf %13, %17 : vector<16x32xf32>
    %c0_5 = arith.constant 0 : index
    %c0_6 = arith.constant 0 : index
    %19 = vector.load %arg2[%c0_5, %c0_6] : memref<1x32xf32, #tpu.memory_space<vmem>>, vector<1x32xf32>
    %20 = vector.broadcast %19 : vector<1x32xf32> to vector<16x32xf32>
    %21 = arith.mulf %18, %20 : vector<16x32xf32>
    %c0_7 = arith.constant 0 : index
    %c0_8 = arith.constant 0 : index
    %22 = vector.load %arg3[%c0_7, %c0_8] : memref<1x32xf32, #tpu.memory_space<vmem>>, vector<1x32xf32>
    %23 = vector.broadcast %22 : vector<1x32xf32> to vector<16x32xf32>
    %24 = arith.addf %21, %23 : vector<16x32xf32>
    %25 = arith.truncf %24 : vector<16x32xf32> to vector<16x32xbf16>
    %c0_9 = arith.constant 0 : index
    %c0_10 = arith.constant 0 : index
    %26 = vector.load %arg4[%c0_9, %c0_10] : memref<16x32xbf16, #tpu.memory_space<vmem>>, vector<16x32xbf16>
    tpu.vector_store %arg4[%c0_9, %c0_10], %25 {strides = array<i32>} : memref<16x32xbf16, #tpu.memory_space<vmem>>, vector<16x32xbf16>,
    return
  }
  func.func @transform_0(%arg0: i32) -> (i32, i32) {
    %c0_i32 = arith.constant 0 : i32
    %c0_i32_0 = arith.constant 0 : i32
    return %arg0, %c0_i32 : i32, i32
  }
  func.func @transform_1(%arg0: i32) -> (i32, i32) {
    %c0_i32 = arith.constant 0 : i32
    %c0_i32_0 = arith.constant 0 : i32
    %c0_i32_1 = arith.constant 0 : i32
    return %c0_i32, %c0_i32_0 : i32, i32
  }
  func.func @transform_2(%arg0: i32) -> (i32, i32) {
    %c0_i32 = arith.constant 0 : i32
    %c0_i32_0 = arith.constant 0 : i32
    %c0_i32_1 = arith.constant 0 : i32
    return %c0_i32, %c0_i32_0 : i32, i32
  }
  func.func @transform_3(%arg0: i32) -> (i32, i32) {
    %c0_i32 = arith.constant 0 : i32
    %c0_i32_0 = arith.constant 0 : i32
    return %arg0, %c0_i32 : i32, i32
  }
}

</mosaic_0001>

<bundles_post_ra>
// kernel: tpu_custom_call.1
= control target key start
LH: loop header
LB: loop body
LE: loop exit
PB: predicated region body
PF: predicated region fallthrough
CT: control target
= control target key end

     0   :  { %8 = vsyncpa [#allocation3], 0  ;;  %s229_s0 = inlined_call_operand.hbm [shape: f32[16,32], index: 0, kind: input, shape index: {}]   ;;  %s230_s1 = inlined_call_operand.vmem [shape: f32[1,32], index: 1, kind: input, shape index: {}]   ;;  %s231_s2 = inlined_call_operand.vmem [shape: f32[1,32], index: 2, kind: input, shape index: {}]   ;;  %s232_s3 = inlined_call_operand.hbm [shape: bf16[16,32], index: 3, kind: output, shape index: {}]  }
   0x1   :  { %9 = vsyncpa [#allocation4], 0  ;;  %s169_s12 = smov [#allocation2]   ;;  %s121_s16 = scalar_lea.hbm %s229_s0, 256 }
   0x2   :  { %s15_s13 = sshll.u32 %s169_s12, 4  ;;  %p122_p0 = scmp.ne.s32.totalorder %s229_s0, %s121_s16  ;;  %s16_s13 = int_to_ptr.vmem [resolvable:$true] %s15_s13 }
   0x3   :  { %p125_p1 = scmp.lt.u32.totalorder %s121_s16, %s229_s0 }
   0x5   :  { %p127_p2 = pnand %p125_p1, %p122_p0 }
   0x7   :  { %130 = shalt.err (!%p127_p2)
}
   0x8   :  { %s131_s21 = scalar_lea.vmem %s16_s13, 256  ;;  %p136_p4 = scmp.lt.s32.totalorder %s16_s13, %s16_s13 }
   0x9   :  { %p132_p3 = scmp.ne.s32.totalorder %s16_s13, %s131_s21  ;;  %p137_p5 = scmp.lt.s32.totalorder %s131_s21, %s131_s21 }
   0xb   :  { %p138_p6 = por %p137_p5, %p136_p4 }
   0xd   :  { %p139_p7 = pnand %p138_p6, %p132_p3 }
   0xf   :  { %142 = shalt.err (!%p139_p7)
}
  0x10   :  { %s170_s22 = smov 128   ;;  %s171_s23 = smov 8  }
  0x11   :  { %21 = dma.hbm_to_vmem [thread:$0]  %s229_s0, 256, %s16_s13, [#allocation3], %s170_s22, %s170_s22, %s171_s23  }
  0x12   :  { %165 = dma.done.wait [#allocation3], 256  }
  0x13   :  { %166 = vsyncadd [#allocation3], 4294967040  ;;  %vm31_vm0 = vcmask 261120   ;;  %v29_v0 = vld [vmem:[#allocation2] sm:$0xff]  ;;  %v30_v1 = vld [vmem:[#allocation2 + $0x8] sm:$0xff]  ;;  %vm85_vm1 = vcmask 257024  }
  0x14   :  { %v32_v2 = vsel %vm31_vm0, %v29_v0, 0.0  ;;  %v35_v3 = vsel %vm31_vm0, %v30_v1, 0.0  ;;  %v105_v21 = vld [vmem:[%s230_s1] ss:$0 sm:$0xff]  ;;  %s172_s29 = smov [#allocation5]  }
  0x15   :  { %33 = vadd.xlane.f32.xlu0 %v32_v2  ;;  %v106_v23 = vld [vmem:[%s231_s2] ss:$0 sm:$0xff]  ;;  %s93_s30 = sshll.u32 %s172_s29, 4  ;;  %s94_s30 = int_to_ptr.vmem [resolvable:$true] %s93_s30 }
  0x16   :  { %s143_s1 = scalar_lea.vmem %s94_s30, 128  ;;  %p148_p9 = scmp.lt.s32.totalorder %s94_s30, %s94_s30 }
  0x17   :  { %p144_p8 = scmp.ne.s32.totalorder %s94_s30, %s143_s1  ;;  %p149_p10 = scmp.lt.s32.totalorder %s143_s1, %s143_s1 }
  0x19   :  { %36 = vadd.xlane.f32.xlu0 %v35_v3  ;;  %p150_p11 = por %p149_p10, %p148_p9 }
  0x1b   :  { %p151_p12 = pnand %p150_p11, %p144_p8 }
  0xa2   :  { %v34_v4 = vpop.xlane.xlu0 %33 }
  0xa3   :  { %v39_v5 = vmul.f32 0.03125, %v34_v4 }
  0xa5   :  { %v41_v6 = vsub.f32 %v29_v0, %v39_v5 }
  0xa6   :  { %v37_v7 = vpop.xlane.xlu0 %36 }
  0xa7   :  { %v40_v8 = vmul.f32 0.03125, %v37_v7  ;;  %v43_v9 = vmul.f32 %v41_v6, %v41_v6 }
  0xa9   :  { %v42_v10 = vsub.f32 %v30_v1, %v40_v8  ;;  %v45_v11 = vsel %vm31_vm0, %v43_v9, 0.0 }
  0xaa   :  { %46 = vadd.xlane.f32.xlu1 %v45_v11 }
  0xab   :  { %v44_v12 = vmul.f32 %v42_v10, %v42_v10 }
  0xad   :  { %v48_v13 = vsel %vm31_vm0, %v44_v12, 0.0 }
  0xae   :  { %49 = vadd.xlane.f32.xlu1 %v48_v13 }
 0x137   :  { %v47_v14 = vpop.xlane.xlu1 %46 }
 0x138   :  { %v51_v15 = vmul.f32 0.03125, %v47_v14 }
 0x13a   :  { %v53_v16 = vadd.f32 1e-12, %v51_v15 }
 0x13b   :  { %v50_v17 = vpop.xlane.xlu1 %49 }
 0x13c   :  { %117 = vrsqrt.f32 %v53_v16  ;;  %v52_v18 = vmul.f32 0.03125, %v50_v17 }
 0x13e   :  { %v54_v19 = vadd.f32 1e-12, %v52_v18 }
 0x140   :  { %119 = vrsqrt.f32 %v54_v19 }
 0x146   :  { %v118_v20 = vpop.eup %117 }
 0x147   :  { %v57_v22 = vmul.f32 %v118_v20, %v41_v6 }
 0x149   :  { %v66_v24 = vmul.f32 %v105_v21, %v57_v22 }
 0x14a   :  { %v120_v25 = vpop.eup %119 }
 0x14b   :  { %v58_v26 = vmul.f32 %v120_v25, %v42_v10  ;;  %v75_v27 = vadd.f32 %v106_v23, %v66_v24 }
 0x14d   :  { %v67_v28 = vmul.f32 %v105_v21, %v58_v26  ;;  %v109_v29 = vpack.c.bf16 %v75_v27, %v75_v27 }
 0x14f   :  { %v76_v30 = vadd.f32 %v106_v23, %v67_v28  ;;  %86 = vst.msk [vmem:[#allocation5] sm:$0xf] %vm85_vm1, %v109_v29 }
 0x151   :  { %v110_v31 = vpack.c.bf16 %v76_v30, %v76_v30 }
 0x153   :  { %87 = vst.msk [vmem:[#allocation5 + $0x4] sm:$0xf] %vm85_vm1, %v110_v31 }
 0x154   :  { %154 = shalt.err (!%p151_p12)
}
 0x155   :  { %s155_s5 = scalar_lea.hbm %s232_s3, 128 }
 0x156   :  { %p156_p13 = scmp.ne.s32.totalorder %s232_s3, %s155_s5  ;;  %p159_p0 = scmp.lt.u32.totalorder %s155_s5, %s232_s3 }
 0x158   :  { %p161_p1 = pnand %p159_p0, %p156_p13 }
 0x15a   :  { %164 = shalt.err (!%p161_p1)
}
 0x15b   :  { %s173_s10 = smov 64   ;;  %s174_s11 = smov 4  }
 0x15c   :  { %99 = dma.vmem_to_hbm [thread:$0]  %s94_s30, 128, %s232_s3, [#allocation4], %s173_s10, %s173_s10, %s174_s11  }
 0x15d   :  { %167 = dma.done.wait [#allocation4], 128  }
 0x15e   :  { %168 = vsyncadd [#allocation4], 4294967168 }
 0x15f   :  { %103 = vsyncpa [#allocation3], 1 }
 0x160   :  { %104 = vsyncpa [#allocation4], 1 }

</bundles_post_ra>
